<compile_context>
chip_gen: v5e
topology: v5e:2x2
jax: 0.10.0
libtpu: 0.0.40
codegen_flags: <defaults>
</compile_context>

<pallas_src>
import math

import jax
import jax.numpy as jnp
import numpy as np
from jax.experimental import pallas as pl
from jax.experimental.pallas import tpu as pltpu


def _attn_kernel(q_ref, k_ref, v_ref, w_ref, o_ref):
    # q_ref: (T, L, E), k_ref: (T, S, E), v_ref: (T, S, D)
    # w_ref: (L, S) = scale * softmax(weight_mat / softplus(tau))   (precomputed)
    # o_ref: (T, L, D)
    q = q_ref[...]
    k = k_ref[...]
    v = v_ref[...]

    # Batched Q K^T on the MXU; contraction on E expressed directly (no k.T copy).
    scores = jnp.einsum('tle,tse->tls', q, k,
                        preferred_element_type=jnp.float32)        # (T, L, S) f32

    # A = softmax(scores * (scale * W), axis=-1); W already carries `scale`.
    a = scores * w_ref[...]                                        # (L,S) broadcasts over T
    a_max = jnp.max(a, axis=-1, keepdims=True)
    a_exp = jnp.exp(a - a_max)
    denom = jnp.sum(a_exp, axis=-1, keepdims=True)
    a = a_exp * pl.reciprocal(denom, approx=True)                  # EUP, not VALU divide
    # TODO(synk): Dropout(attention_dropout=0.1) is identity in eval mode; not applied.

    # A @ V on the MXU (probabilities cast to the matmul dtype, f32 accumulate).
    out = jnp.einsum('tls,tsd->tld', a.astype(v.dtype), v,
                     preferred_element_type=jnp.float32)           # (T, L, D)
    o_ref[...] = out.astype(o_ref.dtype)


def _pick_bh_tile(bh, L, S, E, D, itemsize):
    """Largest divisor of B*H that keeps the per-step (double-buffered) set modest."""
    per_head = 2 * itemsize * (L * E + S * E + S * D + L * D) + 8 * L * S
    budget = 24 * 1024 * 1024
    cap = max(1, min(16, budget // max(per_head, 1)))
    for t in range(min(bh, cap), 0, -1):
        if bh % t == 0:
            return t
    return 1


def full_attention_ablation_2501(queries, keys, values, weight_mat, tau,
                                 scale=None, matmul_dtype=None):
    """queries (B,L,H,E), keys (B,S,H,E), values (B,S,H,D);
       weight_mat (1,1,L,L), tau (1,1,L,1). Returns V (B,L,H,D)."""
    B, L, H, E = queries.shape
    _, S, _, D = values.shape
    scale = scale or 1.0 / math.sqrt(E)
    assert weight_mat.shape[-2:] == (L, S), \
        "weight_mat is (token_num, token_num); requires token_num == L == S"

    # Hoisted, pre-scaled weight matrix (computed once, shared by every grid step):
    #   W = scale * softmax(weight_mat / softplus(tau), axis=-1)   (float32)
    w = (scale * jax.nn.softmax(
        weight_mat.astype(jnp.float32) / jax.nn.softplus(tau.astype(jnp.float32)),
        axis=-1)).reshape(L, S)

    # Flatten (batch, head) into the grid axis. The module fixes num_heads == 1,
    # so the common case needs only a reshape (no HBM-round-trip transpose).
    if H == 1:
        q = queries.reshape(B, L, E)
        k = keys.reshape(B, S, E)
        v = values.reshape(B, S, D)
    else:
        q = jnp.transpose(queries, (0, 2, 1, 3)).reshape(B * H, L, E)
        k = jnp.transpose(keys, (0, 2, 1, 3)).reshape(B * H, S, E)
        v = jnp.transpose(values, (0, 2, 1, 3)).reshape(B * H, S, D)

    if matmul_dtype is not None:          # bf16 MXU path for v6e / v7x
        q = q.astype(matmul_dtype)
        k = k.astype(matmul_dtype)
        v = v.astype(matmul_dtype)

    bh = B * H
    t = _pick_bh_tile(bh, L, S, E, D, jnp.dtype(q.dtype).itemsize)

    out = pl.pallas_call(
        _attn_kernel,
        out_shape=jax.ShapeDtypeStruct((bh, L, D), queries.dtype),
        grid_spec=pltpu.PrefetchScalarGridSpec(
            num_scalar_prefetch=0,
            grid=(bh // t,),
            in_specs=[
                pl.BlockSpec((t, L, E), lambda g: (g, 0, 0)),
                pl.BlockSpec((t, S, E), lambda g: (g, 0, 0)),
                pl.BlockSpec((t, S, D), lambda g: (g, 0, 0)),
                # W is constant across the grid: whole array resident in VMEM,
                # single copy, no per-step pipelining / double buffering.
                pl.BlockSpec(memory_space=pltpu.MemorySpace.VMEM),
            ],
            out_specs=pl.BlockSpec((t, L, D), lambda g: (g, 0, 0)),
        ),
        compiler_params=pltpu.CompilerParams(
            dimension_semantics=("parallel",),
            vmem_limit_bytes=64 * 1024 * 1024),
    )(q, k, v, w)
    # TODO(synk): for very long S on v7x (64 MiB VMEM), add an S-axis grid
    # dimension ("arbitrary") with a flash-style online softmax instead of the
    # full (L, S) score tile; also pack heads into a lane-dense (L, T*D) output
    # slab when D < 128.

    if H == 1:
        return out.reshape(B, L, 1, D)
    return jnp.transpose(out.reshape(B, H, L, D), (0, 2, 1, 3))


def _reference(queries, keys, values, weight_mat, tau, scale=None):
    B, L, H, E = queries.shape
    scale = scale or 1.0 / math.sqrt(E)
    scores = jnp.einsum('blhe,bshe->bhls', queries, keys)
    A = scale * scores
    W = jax.nn.softmax(weight_mat / jax.nn.softplus(tau), axis=-1)
    A = jax.nn.softmax(A * W, axis=-1)
    return jnp.einsum('bhls,bshd->blhd', A, values)


if __name__ == "__main__":
    B, L, H, E = 2, 8, 1, 32      # token_num = L = S = 8, num_heads = 1
    S, D = L, E

    key = jax.random.PRNGKey(0)
    kq, kk, kv, kw = jax.random.split(key, 4)
    queries = jax.random.normal(kq, (B, L, H, E), dtype=jnp.float32)
    keys_ = jax.random.normal(kk, (B, S, H, E), dtype=jnp.float32)
    values = jax.random.normal(kv, (B, S, H, D), dtype=jnp.float32)

    # Deterministic parameter init mirroring __init__:
    #   tau = ones(1,1,token_num,1); weight_mat = eye + randn (num_heads = 1)
    tau = jnp.ones((1, 1, L, 1), dtype=jnp.float32)
    weight_mat = (jnp.eye(L, dtype=jnp.float32)
                  + jax.random.normal(kw, (L, L), dtype=jnp.float32))[None, None]

    ref = _reference(queries, keys_, values, weight_mat, tau)

    # float32 path (tolerance loosened slightly for the approx-reciprocal softmax).
    out = full_attention_ablation_2501(queries, keys_, values, weight_mat, tau)
    jax.block_until_ready(out)
    np.testing.assert_allclose(np.asarray(out), np.asarray(ref),
                               rtol=1e-2, atol=1e-2)

    # bf16 MXU path (v6e/v7x lever); softmax math stays f32 inside the kernel.
    out_bf16 = full_attention_ablation_2501(queries, keys_, values, weight_mat,
                                            tau, matmul_dtype=jnp.bfloat16)
    jax.block_until_ready(out_bf16)
    np.testing.assert_allclose(np.asarray(out_bf16), np.asarray(ref),
                               rtol=5e-2, atol=5e-2)

    print("KERNEL_OK")
</pallas_src>

<mosaic_0001>
module attributes {stable_mosaic.version = 11 : i64} {
  func.func @_attn_kernel(%arg0: i32, %arg1: memref<2x8x32xf32, #tpu.memory_space<vmem>>, %arg2: memref<2x8x32xf32, #tpu.memory_space<vmem>>, %arg3: memref<2x8x32xf32, #tpu.memory_space<vmem>>, %arg4: memref<8x8xf32, #tpu.memory_space<vmem>>, %arg5: memref<2x8x32xf32, #tpu.memory_space<vmem>>) attributes {dimension_semantics = [#tpu.dimension_semantics<parallel>], iteration_bounds = array<i64: 1>, scalar_prefetch = 0 : i64, scratch_operands = 0 : i64, tpu.core_type = #tpu.core_type<tc>, window_params = [{transform_indices = @transform_0, window_bounds = array<i64: 2, 8, 32>}, {transform_indices = @transform_1, window_bounds = array<i64: 2, 8, 32>}, {transform_indices = @transform_2, window_bounds = array<i64: 2, 8, 32>}, {pipeline_mode = #tpu.pipeline_mode<synchronous>, transform_indices = @transform_3, window_bounds = array<i64: 8, 8>}, {transform_indices = @transform_4, window_bounds = array<i64: 2, 8, 32>}]} {
    %c0 = arith.constant 0 : index
    %c0_0 = arith.constant 0 : index
    %c0_1 = arith.constant 0 : index
    %0 = vector.load %arg1[%c0, %c0_0, %c0_1] : memref<2x8x32xf32, #tpu.memory_space<vmem>>, vector<2x8x32xf32>
    %c0_2 = arith.constant 0 : index
    %c0_3 = arith.constant 0 : index
    %c0_4 = arith.constant 0 : index
    %1 = vector.load %arg2[%c0_2, %c0_3, %c0_4] : memref<2x8x32xf32, #tpu.memory_space<vmem>>, vector<2x8x32xf32>
    %c0_5 = arith.constant 0 : index
    %c0_6 = arith.constant 0 : index
    %c0_7 = arith.constant 0 : index
    %2 = vector.load %arg3[%c0_5, %c0_6, %c0_7] : memref<2x8x32xf32, #tpu.memory_space<vmem>>, vector<2x8x32xf32>
    "tpu.trace_start"() <{level = 10 : i32, message = "tle,tse->tls"}> : () -> ()
    %cst = arith.constant dense<0.000000e+00> : vector<2x8x8xf32>
    %3 = tpu.matmul %0, %1, %cst {dimension_numbers = #tpu.dot_dimension_numbers<[2], [2], [1], [1], [0, 0, 0, 1, 1, 1], [0], [0]>} : vector<2x8x32xf32>, vector<2x8x32xf32>, vector<2x8x8xf32> -> vector<2x8x8xf32>
    "tpu.trace_stop"() : () -> ()
    %c0_8 = arith.constant 0 : index
    %c0_9 = arith.constant 0 : index
    %4 = vector.load %arg4[%c0_8, %c0_9] : memref<8x8xf32, #tpu.memory_space<vmem>>, vector<8x8xf32>
    %5 = vector.shape_cast %4 : vector<8x8xf32> to vector<1x8x8xf32>
    %6 = vector.broadcast %5 : vector<1x8x8xf32> to vector<2x8x8xf32>
    %7 = arith.mulf %3, %6 : vector<2x8x8xf32>
    %cst_10 = arith.constant dense<0xFF800000> : vector<2x8xf32>
    %8 = vector.multi_reduction <maximumf>, %7, %cst_10 [2] : vector<2x8x8xf32> to vector<2x8xf32>
    %9 = vector.shape_cast %8 : vector<2x8xf32> to vector<2x8x1xf32>
    %10 = vector.broadcast %9 : vector<2x8x1xf32> to vector<2x8x8xf32>
    %11 = arith.subf %7, %10 : vector<2x8x8xf32>
    %12 = math.exp %11 : vector<2x8x8xf32>
    %cst_11 = arith.constant dense<0.000000e+00> : vector<2x8xf32>
    %13 = vector.multi_reduction <add>, %12, %cst_11 [2] : vector<2x8x8xf32> to vector<2x8xf32>
    %14 = vector.shape_cast %13 : vector<2x8xf32> to vector<2x8x1xf32>
    %15 = tpu.reciprocal %14 {approx = true} : vector<2x8x1xf32> -> vector<2x8x1xf32>
    %16 = vector.broadcast %15 : vector<2x8x1xf32> to vector<2x8x8xf32>
    %17 = arith.mulf %12, %16 : vector<2x8x8xf32>
    "tpu.trace_start"() <{level = 10 : i32, message = "tls,tsd->tld"}> : () -> ()
    %cst_12 = arith.constant dense<0.000000e+00> : vector<2x8x32xf32>
    %18 = tpu.matmul %17, %2, %cst_12 {dimension_numbers = #tpu.dot_dimension_numbers<[2], [1], [1], [2], [0, 0, 0, 1, 1, 2], [0], [0]>} : vector<2x8x8xf32>, vector<2x8x32xf32>, vector<2x8x32xf32> -> vector<2x8x32xf32>
    "tpu.trace_stop"() : () -> ()
    %c0_13 = arith.constant 0 : index
    %c0_14 = arith.constant 0 : index
    %c0_15 = arith.constant 0 : index
    %19 = vector.load %arg5[%c0_13, %c0_14, %c0_15] : memref<2x8x32xf32, #tpu.memory_space<vmem>>, vector<2x8x32xf32>
    tpu.vector_store %arg5[%c0_13, %c0_14, %c0_15], %18 {strides = array<i32>} : memref<2x8x32xf32, #tpu.memory_space<vmem>>, vector<2x8x32xf32>,
    return
  }
  func.func @transform_0(%arg0: i32) -> (i32, i32, i32) {
    %c0_i32 = arith.constant 0 : i32
    %c0_i32_0 = arith.constant 0 : i32
    %c0_i32_1 = arith.constant 0 : i32
    return %arg0, %c0_i32, %c0_i32_0 : i32, i32, i32
  }
  func.func @transform_1(%arg0: i32) -> (i32, i32, i32) {
    %c0_i32 = arith.constant 0 : i32
    %c0_i32_0 = arith.constant 0 : i32
    %c0_i32_1 = arith.constant 0 : i32
    return %arg0, %c0_i32, %c0_i32_0 : i32, i32, i32
  }
  func.func @transform_2(%arg0: i32) -> (i32, i32, i32) {
    %c0_i32 = arith.constant 0 : i32
    %c0_i32_0 = arith.constant 0 : i32
    %c0_i32_1 = arith.constant 0 : i32
    return %arg0, %c0_i32, %c0_i32_0 : i32, i32, i32
  }
  func.func @transform_3(%arg0: i32) -> (i32, i32) {
    %c0_i32 = arith.constant 0 : i32
    %c0_i32_0 = arith.constant 0 : i32
    %c0_i32_1 = arith.constant 0 : i32
    return %c0_i32, %c0_i32_0 : i32, i32
  }
  func.func @transform_4(%arg0: i32) -> (i32, i32, i32) {
    %c0_i32 = arith.constant 0 : i32
    %c0_i32_0 = arith.constant 0 : i32
    %c0_i32_1 = arith.constant 0 : i32
    return %arg0, %c0_i32, %c0_i32_0 : i32, i32, i32
  }
}

</mosaic_0001>

<bundles_post_ra>
// kernel: tpu_custom_call.1
= control target key start
LH: loop header
LB: loop body
LE: loop exit
PB: predicated region body
PF: predicated region fallthrough
CT: control target
= control target key end

     0   :  { %9 = vsyncpa [#allocation3], 0  ;;  %s453_s0 = inlined_call_operand.hbm [shape: f32[2,8,32], index: 0, kind: input, shape index: {}]   ;;  %s454_s1 = inlined_call_operand.hbm [shape: f32[2,8,32], index: 1, kind: input, shape index: {}]   ;;  %s455_s2 = inlined_call_operand.hbm [shape: f32[2,8,32], index: 2, kind: input, shape index: {}]   ;;  %s456_s3 = inlined_call_operand.hbm [shape: f32[8,8], index: 3, kind: input, shape index: {}]   ;;  %s457_s4 = inlined_call_operand.hbm [shape: f32[2,8,32], index: 4, kind: output, shape index: {}]  }
   0x1   :  { %10 = vsyncpa [#allocation6], 0 }
   0x2   :  { %11 = vsyncpa [#allocation9], 0 }
   0x3   :  { %12 = vsyncpa [#allocation4], 0  ;;  %s30_s17 = sshll.u32 %s454_s1, 4  ;;  %s382_s18 = smov [#allocation5]   ;;  %s31_s17 = int_to_ptr.hbm [resolvable:$true] %s30_s17 }
   0x4   :  { %s32_s19 = sshll.u32 %s382_s18, 4  ;;  %s17_s22 = sshll.u32 %s453_s0, 4  ;;  %s33_s19 = int_to_ptr.vmem [resolvable:$true] %s32_s19  ;;  %s18_s22 = int_to_ptr.hbm [resolvable:$true] %s17_s22 }
   0x5   :  { %s383_s23 = smov 128   ;;  %s384_s24 = smov 8  }
   0x6   :  { %38 = dma.hbm_to_vmem [thread:$0]  %s31_s17, 256, %s33_s19, [#allocation6], %s383_s23, %s383_s23, %s384_s24  }
   0x7   :  { %s385_s25 = smov [#allocation2]   ;;  %s43_s1 = sshll.u32 %s455_s2, 4  ;;  %s44_s1 = int_to_ptr.hbm [resolvable:$true] %s43_s1 }
   0x8   :  { %s19_s26 = sshll.u32 %s385_s25, 4  ;;  %s57_s30 = sshll.u32 %s456_s3, 4  ;;  %s20_s26 = int_to_ptr.vmem [resolvable:$true] %s19_s26  ;;  %s58_s30 = int_to_ptr.hbm [resolvable:$true] %s57_s30 }
   0x9   :  { %25 = dma.hbm_to_vmem [thread:$0]  %s18_s22, 256, %s20_s26, [#allocation3], %s383_s23, %s383_s23, %s384_s24  }
   0xa   :  { %s386_s5 = smov [#allocation7]   ;;  %s387_s7 = smov [#allocation8]  }
   0xb   :  { %s45_s6 = sshll.u32 %s386_s5, 4  ;;  %s59_s2 = sshll.u32 %s387_s7, 4  ;;  %s46_s6 = int_to_ptr.vmem [resolvable:$true] %s45_s6  ;;  %s60_s2 = int_to_ptr.vmem [resolvable:$true] %s59_s2 }
   0xc   :  { %51 = dma.hbm_to_vmem [thread:$0]  %s44_s1, 256, %s46_s6, [#allocation6], %s383_s23, %s383_s23, %s384_s24  }
   0xd   :  { %62 = dma.hbm_to_vmem [thread:$0]  %s58_s30, 128, %s60_s2, [#allocation9]  }
   0xe   :  { %374 = dma.done.wait [#allocation3], 256  }
   0xf   :  { %375 = vsyncadd [#allocation3], 4294967040 }
  0x10   :  { %376 = dma.done.wait [#allocation6], 512  }
  0x11   :  { %377 = vsyncadd [#allocation6], 4294966784 }
  0x12   :  { %378 = dma.done.wait [#allocation9], 128  }
  0x13   :  { %379 = vsyncadd [#allocation9], 4294967168  ;;  %vm85_vm0 = vcmask 261120   ;;  %v81_v0 = vld [vmem:[#allocation5] sm:$0xff]  ;;  %v82_v1 = vld [vmem:[#allocation5 + $0x8] sm:$0xff]  ;;  %vm141_vm1 = vcmask 64512  }
  0x14   :  { %233 = vmatpush.xpose.msk.msra.mxu0 %vm85_vm0, %v81_v0  ;;  %v79_v2 = vld [vmem:[#allocation2] sm:$0xff]  ;;  %235 = vmatpush.xpose.msk.msra.mxu1 %vm85_vm0, %v82_v1  ;;  %v80_v3 = vld [vmem:[#allocation2 + $0x8] sm:$0xff]  ;;  %v138_v4 = vld [vmem:[#allocation8] sm:$0xff]  ;;  %s388_s3 = smov [#allocation10]   ;;  %s218_s11 = sshll.u32 %s457_s4, 4  ;;  %s219_s11 = int_to_ptr.hbm [resolvable:$true] %s218_s11 }
  0x15   :  { %v83_v21 = vld [vmem:[#allocation7] sm:$0xff]  ;;  %v84_v22 = vld [vmem:[#allocation7 + $0x8] sm:$0xff]  ;;  %s216_s8 = sshll.u32 %s388_s3, 4  ;;  %s217_s8 = int_to_ptr.vmem [resolvable:$true] %s216_s8 }
  0x16   :  { %182 = vmatpush.msra.mxu2 %v83_v21  ;;  %205 = vmatpush.msra.mxu3 %v84_v22 }
  0x17   :  { %234 = vmatmul.msk.f32.vlgmr.msra.gmra.mxu0 %vm85_vm0, %v79_v2  ;;  %236 = vmatmul.msk.f32.vlgmr.msra.gmra.mxu1 %vm85_vm0, %v80_v3 }
  0x94   :  { %v109_v5 = vpop.f32.mrf.mxu0  ;;  %v135_v7 = vpop.f32.mrf.mxu1 }
  0x95   :  { %v139_v6 = vmul.f32 %v138_v4, %v109_v5  ;;  %v140_v9 = vmul.f32 %v138_v4, %v135_v7 }
  0x97   :  { %v142_v8 = vsel %vm141_vm1, %v139_v6, -inf  ;;  %v145_v10 = vsel %vm141_vm1, %v140_v9, -inf }
  0x98   :  { %143 = vmax.xlane.f32.xlu0 %v142_v8 }
  0xa0   :  { %146 = vmax.xlane.f32.xlu0 %v145_v10 }
 0x10b   :  { %v144_v11 = vpop.xlane.xlu0 %143 }
 0x10c   :  { %v148_v12 = vsub.f32 %v139_v6, %v144_v11 }
 0x10e   :  { %v150_v13 = vmul.f32 1.442695, %v148_v12 }
 0x110   :  { %246 = vpow2.f32 %v150_v13 }
 0x113   :  { %v147_v14 = vpop.xlane.xlu0 %146 }
 0x114   :  { %v149_v15 = vsub.f32 %v140_v9, %v147_v14 }
 0x116   :  { %v247_v16 = vpop.eup %246  ;;  %v152_v17 = vmul.f32 1.442695, %v149_v15 }
 0x117   :  { %v154_v18 = vsel %vm141_vm1, %v247_v16, 0.0 }
 0x118   :  { %248 = vpow2.f32 %v152_v17  ;;  %155 = vadd.xlane.f32.xlu1 %v154_v18 }
 0x11e   :  { %v249_v19 = vpop.eup %248 }
 0x11f   :  { %v157_v20 = vsel %vm141_vm1, %v249_v19, 0.0 }
 0x120   :  { %158 = vadd.xlane.f32.xlu1 %v157_v20 }
 0x18b   :  { %v156_v23 = vpop.xlane.xlu1 %155 }
 0x18c   :  { %250 = vrcp.f32 %v156_v23 }
 0x192   :  { %v251_v24 = vpop.eup %250 }
 0x193   :  { %v159_v25 = vpop.xlane.xlu1 %158  ;;  %v162_v26 = vmul.f32 %v251_v24, %v247_v16 }
 0x194   :  { %252 = vrcp.f32 %v159_v25 }
 0x195   :  { %237 = vmatmul.msk.f32.vlgmr.msra.gmra.mxu2 %vm141_vm1, %v162_v26 }
 0x19a   :  { %v253_v27 = vpop.eup %252 }
 0x19b   :  { %v163_v28 = vmul.f32 %v253_v27, %v249_v19 }
 0x19d   :  { %238 = vmatmul.msk.f32.vlgmr.msra.gmra.mxu3 %vm141_vm1, %v163_v28 }
 0x218   :  { %v184_v29 = vpop.f32.mrf.mxu2 }
 0x219   :  { %210 = vst.msk [vmem:[#allocation10] sm:$0xff] %vm85_vm0, %v184_v29 }
 0x220   :  { %v207_v30 = vpop.f32.mrf.mxu3 }
 0x221   :  { %211 = vst.msk [vmem:[#allocation10 + $0x8] sm:$0xff] %vm85_vm0, %v207_v30 }
 0x222   :  { %224 = dma.vmem_to_hbm [thread:$0]  %s217_s8, 256, %s219_s11, [#allocation4], %s383_s23, %s383_s23, %s384_s24  }
 0x223   :  { %380 = dma.done.wait [#allocation4], 256  }
 0x224   :  { %381 = vsyncadd [#allocation4], 4294967040 }
 0x225   :  { %229 = vsyncpa [#allocation3], 1 }
 0x226   :  { %230 = vsyncpa [#allocation6], 1 }
 0x227   :  { %231 = vsyncpa [#allocation9], 1 }
 0x228   :  { %232 = vsyncpa [#allocation4], 1 }

</bundles_post_ra>
